<compile_context>
chip_gen: v7x
topology: tpu7x:2x2x1
jax: 0.10.0
libtpu: 0.0.40
codegen_flags: <defaults>
</compile_context>

<pallas_src>
import jax
import jax.numpy as jnp
from jax.experimental import pallas as pl
from jax.experimental.pallas import tpu as pltpu


def _round_up(v, m):
    return -(-v // m) * m


# ----------------------------- kernels ------------------------------------- #

def _cheb1_kernel(lhat_ref, xw1t_ref, xw0t_ref, b1t_ref, h1t_ref):
    """Layer-1 ChebConv(K=2) + ReLU for one column tile of nodes (transposed).

    h1^T[:, tile] = relu( (x W0)^T[:, tile] + (x W1)^T @ L_hat[:, tile] + b1^T )
    The N x N propagation has the node tile on lanes (MXU output dim).
    """
    prop = jnp.dot(xw1t_ref[...], lhat_ref[...],
                   preferred_element_type=jnp.float32)        # (hidden, tn)
    h = xw0t_ref[...] + prop + b1t_ref[...]
    h1t_ref[...] = jnp.maximum(h, 0.0).astype(h1t_ref.dtype)  # bf16 out


def _cheb2_linear_kernel(lhat_ref, h1t_ref, w20t_ref, w21t_ref, b2t_ref,
                         wlt_ref, blt_ref, outt_ref):
    """Layer-2 ChebConv(K=2) + ReLU + Linear for one column tile (transposed).

    out^T[:, tile] = W_lin^T @ relu(W2_0^T @ h1^T[:, tile]
                                    + W2_1^T @ (h1^T @ L_hat[:, tile]) + b2^T)
                     + b_lin^T
    """
    tn = lhat_ref.shape[1]
    start = pl.multiple_of(pl.program_id(0) * tn, tn)
    h1_tile = h1t_ref[:, pl.ds(start, tn)]                     # (hidden, tn) bf16

    lh1 = jnp.dot(h1t_ref[...], lhat_ref[...],
                  preferred_element_type=jnp.float32)           # (hidden, tn)
    h = (jnp.dot(w20t_ref[...], h1_tile, preferred_element_type=jnp.float32)
         + jnp.dot(w21t_ref[...], lh1.astype(jnp.bfloat16),
                   preferred_element_type=jnp.float32)
         + b2t_ref[...])
    h = jnp.maximum(h, 0.0)
    outt_ref[...] = (jnp.dot(wlt_ref[...], h.astype(jnp.bfloat16),
                             preferred_element_type=jnp.float32)
                     + blt_ref[...])


# ----------------------------- tiling / budgets ----------------------------- #

def _vmem_capacity_bytes():
    try:
        return int(pltpu.get_tpu_info().vmem_capacity_bytes)
    except Exception:
        return 64 << 20      # conservative fallback (v7x per-TC VMEM)


def choose_tiling(num_nodes):
    """Pick (n_pad, col_tile).

    col_tile is a multiple of 256 sized against a VMEM budget of ~1/4 capacity
    for the double-buffered bf16 L_hat column tile; n_pad is a multiple of
    col_tile (hence of 256), so all L_hat loads and output stores are
    lane-dense.  (Very large dense graphs would additionally need 2-D tiling of
    L_hat with accumulation; out of scope here.)
    """
    cap = _vmem_capacity_bytes()
    lhat_budget = cap // 4                    # double-buffered L_hat tile cap
    n_pad0 = _round_up(num_nodes, 256)
    tn = 256
    while tn < n_pad0 and 2 * n_pad0 * (tn * 2) * 2 <= lhat_budget:
        tn *= 2
    tn = min(tn, n_pad0)
    n_pad = _round_up(num_nodes, tn)
    # Prefer >=2 column tiles so v7x's two TensorCores both get work.
    if n_pad // tn == 1 and tn > 256:
        tn //= 2
    return n_pad, tn


def prepare_lhat(l_hat, n_pad):
    """One-time (graph-build time) pad + bf16 cast of the dense scaled Laplacian."""
    n = l_hat.shape[0]
    return jnp.zeros((n_pad, n_pad), jnp.bfloat16).at[:n, :n].set(
        l_hat.astype(jnp.bfloat16))


def _vmem_limit_bytes(buffer_bytes, cap):
    need = 2 * sum(buffer_bytes) + (2 << 20)   # double-buffering + slack
    ceiling = cap - (12 << 20)                 # leave compiler scratch headroom
    return int(max(4 << 20, min(need, ceiling)))


# ----------------------------- wrapper -------------------------------------- #

def gcn_forward(x, lhat_p, params, *, col_tile, num_valid):
    """Fused GCN forward.

    x:       (N, F_in) f32 node features (N == num_valid).
    lhat_p:  (n_pad, n_pad) bf16 padded scaled Laplacian (from prepare_lhat).
    Returns: (N, transformer_feature_size) f32.
    """
    n = num_valid
    n_pad = lhat_p.shape[0]
    tn = col_tile
    f_in = x.shape[1]
    hidden = params["w1_0"].shape[1]
    g_out = params["w2_0"].shape[1]
    t_feat = params["w_lin"].shape[1]
    num_tiles = n_pad // tn
    grid = (num_tiles,)
    cap = _vmem_capacity_bytes()

    # --- hoisted projections / transposed small operands (once per forward) ---
    x_p = jnp.zeros((n_pad, f_in), jnp.float32).at[:n].set(x)
    xw0t = (x_p @ params["w1_0"]).T                         # (hidden, n_pad) f32
    xw1t = (x_p @ params["w1_1"]).T.astype(jnp.bfloat16)    # (hidden, n_pad) bf16
    b1t = params["b1"].T                                    # (hidden, 1) f32

    w20t = params["w2_0"].T.astype(jnp.bfloat16)            # (g_out, hidden)
    w21t = params["w2_1"].T.astype(jnp.bfloat16)
    b2t = params["b2"].T                                    # (g_out, 1) f32
    wlt = params["w_lin"].T.astype(jnp.bfloat16)            # (t_feat, g_out)
    blt = params["b_lin"].T                                 # (t_feat, 1) f32

    # --------------------------- call 1: conv1 + relu ------------------------
    vmem1 = _vmem_limit_bytes([
        n_pad * tn * 2,          # L_hat column tile (bf16)
        hidden * n_pad * 2,      # (x W1)^T resident (bf16)
        hidden * tn * 4,         # (x W0)^T column tile (f32)
        hidden * 4,              # b1^T
        hidden * tn * 2,         # h1^T column tile out (bf16)
    ], cap)
    cost1 = pl.CostEstimate(
        flops=int(2 * hidden * n_pad * n_pad),
        transcendentals=0,
        bytes_accessed=int(n_pad * n_pad * 2 + hidden * n_pad * (2 + 4 + 2)),
    )
    h1t = pl.pallas_call(
        _cheb1_kernel,
        out_shape=jax.ShapeDtypeStruct((hidden, n_pad), jnp.bfloat16),
        grid_spec=pltpu.PrefetchScalarGridSpec(
            num_scalar_prefetch=0,
            grid=grid,
            in_specs=[
                pl.BlockSpec((n_pad, tn), lambda i: (0, i)),      # L_hat col tile
                pl.BlockSpec((hidden, n_pad), lambda i: (0, 0)),  # (x W1)^T resident
                pl.BlockSpec((hidden, tn), lambda i: (0, i)),     # (x W0)^T tile
                pl.BlockSpec((hidden, 1), lambda i: (0, 0)),      # b1^T
            ],
            out_specs=pl.BlockSpec((hidden, tn), lambda i: (0, i)),
        ),
        compiler_params=pltpu.CompilerParams(
            dimension_semantics=("parallel",),
            vmem_limit_bytes=vmem1),
        cost_estimate=cost1,
    )(lhat_p, xw1t, xw0t, b1t)

    # ----------------------- call 2: conv2 + relu + linear -------------------
    vmem2 = _vmem_limit_bytes([
        n_pad * tn * 2,          # L_hat column tile (bf16)
        hidden * n_pad * 2,      # h1^T resident (bf16)
        2 * g_out * hidden * 2 + g_out * 4,
        t_feat * g_out * 2 + t_feat * 4,
        t_feat * tn * 4,         # output column tile (f32)
    ], cap)
    cost2 = pl.CostEstimate(
        flops=int(2 * hidden * n_pad * n_pad
                  + 2 * n_pad * hidden * g_out * 2
                  + 2 * n_pad * g_out * t_feat),
        transcendentals=0,
        bytes_accessed=int(n_pad * n_pad * 2 + 2 * hidden * n_pad * 2
                           + t_feat * n_pad * 4
                           + 2 * (2 * g_out * hidden + t_feat * g_out)),
    )
    out_t = pl.pallas_call(
        _cheb2_linear_kernel,
        out_shape=jax.ShapeDtypeStruct((t_feat, n_pad), jnp.float32),
        grid_spec=pltpu.PrefetchScalarGridSpec(
            num_scalar_prefetch=0,
            grid=grid,
            in_specs=[
                pl.BlockSpec((n_pad, tn), lambda i: (0, i)),      # L_hat col tile
                pl.BlockSpec((hidden, n_pad), lambda i: (0, 0)),  # h1^T resident
                pl.BlockSpec((g_out, hidden), lambda i: (0, 0)),  # W2_0^T
                pl.BlockSpec((g_out, hidden), lambda i: (0, 0)),  # W2_1^T
                pl.BlockSpec((g_out, 1), lambda i: (0, 0)),       # b2^T
                pl.BlockSpec((t_feat, g_out), lambda i: (0, 0)),  # W_lin^T
                pl.BlockSpec((t_feat, 1), lambda i: (0, 0)),      # b_lin^T
            ],
            out_specs=pl.BlockSpec((t_feat, tn), lambda i: (0, i)),
        ),
        compiler_params=pltpu.CompilerParams(
            dimension_semantics=("parallel",),
            vmem_limit_bytes=vmem2),
        cost_estimate=cost2,
    )(lhat_p, h1t, w20t, w21t, b2t, wlt, blt)

    # Only the first n node columns are valid (padded columns may hold relu(b1));
    # slice first, then transpose back to node-major once.
    return out_t[:, :n].T


# ------------------------ graph / params / reference ------------------------ #

def build_scaled_laplacian(edge_index, num_nodes):
    """Dense L_hat = 2L/lambda_max - I with lambda_max=2 -> -D^{-1/2} A D^{-1/2}."""
    # TODO(synk): dense scatter of edge_index done in plain JAX (no clean Pallas
    # equivalent for sparse edge scatter at this size).
    src, dst = edge_index
    a = jnp.zeros((num_nodes, num_nodes), jnp.float32)
    a = a.at[src, dst].set(1.0)
    a = jnp.maximum(a, a.T)                          # symmetrize (undirected graph)
    deg = a.sum(axis=1)
    dinv = jnp.where(deg > 0, jax.lax.rsqrt(deg), 0.0)
    return -(dinv[:, None] * a * dinv[None, :])


def init_params(key, num_input_features, gcn_output_features, transformer_feature_size):
    hidden = 3  # conv1 output channels, fixed in the module
    ks = jax.random.split(key, 6)

    def glorot(k, fan_in, fan_out):
        lim = (6.0 / (fan_in + fan_out)) ** 0.5
        return jax.random.uniform(k, (fan_in, fan_out), jnp.float32, -lim, lim)

    return {
        # ChebConv 1: K=2 -> two weight matrices + bias
        "w1_0": glorot(ks[0], num_input_features, hidden),
        "w1_1": glorot(ks[1], num_input_features, hidden),
        "b1": jnp.zeros((1, hidden), jnp.float32),
        # ChebConv 2
        "w2_0": glorot(ks[2], hidden, gcn_output_features),
        "w2_1": glorot(ks[3], hidden, gcn_output_features),
        "b2": jnp.zeros((1, gcn_output_features), jnp.float32),
        # nn.Linear(gcn_output_features, transformer_feature_size)
        "w_lin": glorot(ks[4], gcn_output_features, transformer_feature_size),
        "b_lin": jax.random.uniform(
            ks[5], (1, transformer_feature_size), jnp.float32,
            -(1.0 / gcn_output_features) ** 0.5, (1.0 / gcn_output_features) ** 0.5),
    }


def gcn_reference(x, l_hat, params):
    """Pure-JAX f32 reference of the same forward."""
    h1 = jax.nn.relu(x @ params["w1_0"] + (l_hat @ x) @ params["w1_1"] + params["b1"])
    h2 = jax.nn.relu(h1 @ params["w2_0"] + (l_hat @ h1) @ params["w2_1"] + params["b2"])
    return h2 @ params["w_lin"] + params["b_lin"]


if __name__ == "__main__":
    num_input_features = 4
    gcn_output_features = 8
    transformer_feature_size = 32
    num_nodes = 16

    key = jax.random.PRNGKey(0)
    k_x, k_p = jax.random.split(key)

    # Node features (N, F_in)
    x = jax.random.normal(k_x, (num_nodes, num_input_features), jnp.float32)

    # Ring graph edge_index (2, E), undirected (both directions included)
    src = jnp.arange(num_nodes, dtype=jnp.int32)
    dst = (src + 1) % num_nodes
    edge_index = jnp.stack(
        [jnp.concatenate([src, dst]), jnp.concatenate([dst, src])], axis=0)

    l_hat = build_scaled_laplacian(edge_index, num_nodes)
    params = init_params(k_p, num_input_features, gcn_output_features,
                         transformer_feature_size)

    # Graph-build-time preprocessing (done once, reused across forward calls).
    n_pad, col_tile = choose_tiling(num_nodes)
    lhat_p = prepare_lhat(l_hat, n_pad)
    jax.block_until_ready(lhat_p)

    out = gcn_forward(x, lhat_p, params, col_tile=col_tile, num_valid=num_nodes)
    jax.block_until_ready(out)

    ref = gcn_reference(x, l_hat, params)
    assert out.shape == (num_nodes, transformer_feature_size)
    assert bool(jnp.all(jnp.isfinite(out)))
    # bf16 L_hat / h1 / weight operands -> loose tolerance vs f32 reference
    assert bool(jnp.allclose(out, ref, atol=5e-2, rtol=5e-2))
    print("KERNEL_OK")
</pallas_src>

<mosaic_0001>
module attributes {stable_mosaic.version = 11 : i64} {
  func.func @_cheb1_kernel(%arg0: i32, %arg1: memref<256x256xbf16, #tpu.memory_space<vmem>>, %arg2: memref<3x256xbf16, #tpu.memory_space<vmem>>, %arg3: memref<3x256xf32, #tpu.memory_space<vmem>>, %arg4: memref<3x1xf32, #tpu.memory_space<vmem>>, %arg5: memref<3x256xbf16, #tpu.memory_space<vmem>>) attributes {dimension_semantics = [#tpu.dimension_semantics<parallel>], iteration_bounds = array<i64: 1>, scalar_prefetch = 0 : i64, scratch_operands = 0 : i64, tpu.core_type = #tpu.core_type<tc>, window_params = [{transform_indices = @transform_0, window_bounds = array<i64: 256, 256>}, {pipeline_mode = #tpu.pipeline_mode<synchronous>, transform_indices = @transform_1, window_bounds = array<i64: 3, 256>}, {transform_indices = @transform_2, window_bounds = array<i64: 3, 256>}, {pipeline_mode = #tpu.pipeline_mode<synchronous>, transform_indices = @transform_3, window_bounds = array<i64: 3, 1>}, {transform_indices = @transform_4, window_bounds = array<i64: 3, 256>}]} {
    %c0 = arith.constant 0 : index
    %c0_0 = arith.constant 0 : index
    %0 = vector.load %arg2[%c0, %c0_0] : memref<3x256xbf16, #tpu.memory_space<vmem>>, vector<3x256xbf16>
    %c0_1 = arith.constant 0 : index
    %c0_2 = arith.constant 0 : index
    %1 = vector.load %arg1[%c0_1, %c0_2] : memref<256x256xbf16, #tpu.memory_space<vmem>>, vector<256x256xbf16>
    %cst = arith.constant dense<0.000000e+00> : vector<3x256xf32>
    %2 = tpu.matmul %0, %1, %cst {dimension_numbers = #tpu.dot_dimension_numbers<[1], [0], [0], [1], [0, 0, 1, 1], [], []>} : vector<3x256xbf16>, vector<256x256xbf16>, vector<3x256xf32> -> vector<3x256xf32>
    %c0_3 = arith.constant 0 : index
    %c0_4 = arith.constant 0 : index
    %3 = vector.load %arg3[%c0_3, %c0_4] : memref<3x256xf32, #tpu.memory_space<vmem>>, vector<3x256xf32>
    %4 = arith.addf %3, %2 : vector<3x256xf32>
    %c0_5 = arith.constant 0 : index
    %c0_6 = arith.constant 0 : index
    %5 = vector.load %arg4[%c0_5, %c0_6] : memref<3x1xf32, #tpu.memory_space<vmem>>, vector<3x1xf32>
    %6 = vector.broadcast %5 : vector<3x1xf32> to vector<3x256xf32>
    %7 = arith.addf %4, %6 : vector<3x256xf32>
    %cst_7 = arith.constant 0.000000e+00 : f32
    %8 = vector.broadcast %cst_7 : f32 to vector<3x256xf32>
    %9 = arith.maximumf %7, %8 : vector<3x256xf32>
    %10 = arith.truncf %9 : vector<3x256xf32> to vector<3x256xbf16>
    %c0_8 = arith.constant 0 : index
    %c0_9 = arith.constant 0 : index
    %11 = vector.load %arg5[%c0_8, %c0_9] : memref<3x256xbf16, #tpu.memory_space<vmem>>, vector<3x256xbf16>
    tpu.vector_store %arg5[%c0_8, %c0_9], %10 {strides = array<i32>} : memref<3x256xbf16, #tpu.memory_space<vmem>>, vector<3x256xbf16>,
    return
  }
  func.func @transform_0(%arg0: i32) -> (i32, i32) {
    %c0_i32 = arith.constant 0 : i32
    %c0_i32_0 = arith.constant 0 : i32
    return %c0_i32, %arg0 : i32, i32
  }
  func.func @transform_1(%arg0: i32) -> (i32, i32) {
    %c0_i32 = arith.constant 0 : i32
    %c0_i32_0 = arith.constant 0 : i32
    %c0_i32_1 = arith.constant 0 : i32
    return %c0_i32, %c0_i32_0 : i32, i32
  }
  func.func @transform_2(%arg0: i32) -> (i32, i32) {
    %c0_i32 = arith.constant 0 : i32
    %c0_i32_0 = arith.constant 0 : i32
    return %c0_i32, %arg0 : i32, i32
  }
  func.func @transform_3(%arg0: i32) -> (i32, i32) {
    %c0_i32 = arith.constant 0 : i32
    %c0_i32_0 = arith.constant 0 : i32
    %c0_i32_1 = arith.constant 0 : i32
    return %c0_i32, %c0_i32_0 : i32, i32
  }
  func.func @transform_4(%arg0: i32) -> (i32, i32) {
    %c0_i32 = arith.constant 0 : i32
    %c0_i32_0 = arith.constant 0 : i32
    return %c0_i32, %arg0 : i32, i32
  }
}

</mosaic_0001>

<bundles_post_ra>
// kernel: tpu_custom_call.1
= control target key start
LH: loop header
LB: loop body
LE: loop exit
PB: predicated region body
PF: predicated region fallthrough
CT: control target
= control target key end

     0   :  { %9 = vsyncpa [#allocation3], 0  ;;  %s542_s0 = inlined_call_operand.hbm [shape: bf16[256,256], index: 0, kind: input, shape index: {}]   ;;  %s543_s1 = inlined_call_operand.vmem [shape: bf16[3,256], index: 1, kind: input, shape index: {}]   ;;  %s544_s2 = inlined_call_operand.vmem [shape: f32[3,256], index: 2, kind: input, shape index: {}]   ;;  %s545_s3 = inlined_call_operand.vmem [shape: f32[3,1], index: 3, kind: input, shape index: {}]   ;;  %s546_s4 = inlined_call_operand.hbm [shape: bf16[3,256], index: 4, kind: output, shape index: {}]  }
   0x1   :  { %10 = vsyncpa [#allocation4], 0  ;;  %s477_s15 = smov [#allocation2]   ;;  %s429_s19 = scalar_lea.hbm %s542_s0, 4096 }
   0x2   :  { %s16_s16 = sshll.u32 %s477_s15, 4  ;;  %p430_p0 = scmp.ne.s32.totalorder %s542_s0, %s429_s19  ;;  %s17_s16 = int_to_ptr.vmem [resolvable:$true] %s16_s16 }
   0x3   :  { %p433_p1 = scmp.lt.u32.totalorder %s429_s19, %s542_s0 }
   0x5   :  { %p435_p2 = pnand %p433_p1, %p430_p0 }
   0x7   :  { %438 = shalt.err (!%p435_p2)
}
   0x8   :  { %s439_s24 = scalar_lea.vmem %s17_s16, 4096  ;;  %p444_p4 = scmp.lt.s32.totalorder %s17_s16, %s17_s16 }
   0x9   :  { %p440_p3 = scmp.ne.s32.totalorder %s17_s16, %s439_s24  ;;  %p445_p5 = scmp.lt.s32.totalorder %s439_s24, %s439_s24 }
   0xb   :  { %p446_p6 = por %p445_p5, %p444_p4 }
   0xd   :  { %p447_p7 = pnand %p446_p6, %p440_p3 }
   0xf   :  { %450 = shalt.err (!%p447_p7)
}
  0x10   :  { %s478_s25 = smov 128   ;;  %s479_s26 = smov 8  }
  0x11   :  { %22 = dma.hbm_to_vmem [thread:$0]  %s542_s0, 4096, %s17_s16, [#allocation3], %s478_s25, %s478_s25, %s479_s26  }
  0x12   :  { %473 = dma.done.wait [#allocation3], 4096  }
  0x13   :  { %474 = vsyncadd [#allocation3], 4294963200  ;;  %v480_v0 = vmov 0   ;;  %v381_v1 = vld [vmem:[#allocation2 + $0x4] ss:$8 sps:$4 sm:$0xff]   ;;  %v291_v38 = vlaneseq  ;;  %vm314_vm0 = vcmask 1041408  }
  0x14   :  { %380 = vset.pattern.permute.xlu0 %v480_v0  ;;  %v383_v2 = vld [vmem:[#allocation2] ss:$8 sps:$4 sm:$0xff]   ;;  %236 = vmatprep.subr.bf16.mxu0 %v381_v1  ;;  %v384_v3 = vld [vmem:[#allocation2 + $0x14] ss:$8 sps:$4 sm:$0xff]   ;;  %v386_v4 = vld [vmem:[#allocation2 + $0x10] ss:$8 sps:$4 sm:$0xff]  }
  0x15   :  { %237 = vmatpush1.bf16.msra.mxu0 %v383_v2  ;;  %v387_v5 = vld [vmem:[#allocation2 + $0x24] ss:$8 sps:$4 sm:$0xff]   ;;  %v389_v6 = vld [vmem:[#allocation2 + $0x20] ss:$8 sps:$4 sm:$0xff]   ;;  %v390_v7 = vld [vmem:[#allocation2 + $0x34] ss:$8 sps:$4 sm:$0xff]  }
  0x16   :  { %238 = vmatprep.subr.bf16.mxu0 %v384_v3  ;;  %v392_v8 = vld [vmem:[#allocation2 + $0x30] ss:$8 sps:$4 sm:$0xff]   ;;  %v393_v9 = vld [vmem:[#allocation2 + $0x44] ss:$8 sps:$4 sm:$0xff]   ;;  %v395_v10 = vld [vmem:[#allocation2 + $0x40] ss:$8 sps:$4 sm:$0xff]  }
  0x17   :  { %v396_v11 = vld [vmem:[#allocation2 + $0x54] ss:$8 sps:$4 sm:$0xff]   ;;  %v398_v12 = vld [vmem:[#allocation2 + $0x50] ss:$8 sps:$4 sm:$0xff]   ;;  %v399_v13 = vld [vmem:[#allocation2 + $0x64] ss:$8 sps:$4 sm:$0xff]  }
  0x18   :  { %v339_v14 = vld.sshfl [vmem:[%s543_s1] sm:$0x33 pattern:$0x76325410]  ;;  %v402_v18 = vld [vmem:[#allocation2 + $0x74] ss:$8 sps:$4 sm:$0xff]  }
  0x19   :  { %239 = vmatpush1.bf16.msra.mxu0 %v386_v4  ;;  %v73_v15 = vcombine.high %v339_v14, %v339_v14  ;;  %v283_v16 = vld [vmem:[%s545_s3] sm:$0x7]  ;;  %v404_v19 = vld [vmem:[#allocation2 + $0x70] ss:$8 sps:$4 sm:$0xff]   ;;  %v405_v20 = vld [vmem:[#allocation2 + $0x84] ss:$8 sps:$4 sm:$0xff]  }
  0x1a   :  { %240 = vmatprep.subr.bf16.mxu0 %v387_v5  ;;  %v401_v17 = vld [vmem:[#allocation2 + $0x60] ss:$8 sps:$4 sm:$0xff]   ;;  %286 = vperm.xlu0 %380, %v283_v16   ;;  %v408_v22 = vld [vmem:[#allocation2 + $0x94] ss:$8 sps:$4 sm:$0xff]   ;;  %v410_v23 = vld [vmem:[#allocation2 + $0x90] ss:$8 sps:$4 sm:$0xff]  }
  0x1b   :  { %268 = vmatprep.mubr.bf16.mxu0 %v73_v15  ;;  %v407_v21 = vld [vmem:[#allocation2 + $0x80] ss:$8 sps:$4 sm:$0xff]   ;;  %v411_v24 = vld [vmem:[#allocation2 + $0xa4] ss:$8 sps:$4 sm:$0xff]   ;;  %v414_v26 = vld [vmem:[#allocation2 + $0xb4] ss:$8 sps:$4 sm:$0xff]  }
  0x1c   :  { %v413_v25 = vld [vmem:[#allocation2 + $0xa0] ss:$8 sps:$4 sm:$0xff]   ;;  %v416_v27 = vld [vmem:[#allocation2 + $0xb0] ss:$8 sps:$4 sm:$0xff]   ;;  %v417_v28 = vld [vmem:[#allocation2 + $0xc4] ss:$8 sps:$4 sm:$0xff]  }
  0x1d   :  { %241 = vmatpush1.bf16.msra.mxu0 %v389_v6  ;;  %v419_v29 = vld [vmem:[#allocation2 + $0xc0] ss:$8 sps:$4 sm:$0xff]   ;;  %v420_v30 = vld [vmem:[#allocation2 + $0xd4] ss:$8 sps:$4 sm:$0xff]   ;;  %v422_v31 = vld [vmem:[#allocation2 + $0xd0] ss:$8 sps:$4 sm:$0xff]  }
  0x1e   :  { %242 = vmatprep.subr.bf16.mxu0 %v390_v7  ;;  %v423_v32 = vld [vmem:[#allocation2 + $0xe4] ss:$8 sps:$4 sm:$0xff]   ;;  %v425_v33 = vld [vmem:[#allocation2 + $0xe0] ss:$8 sps:$4 sm:$0xff]   ;;  %v426_v34 = vld [vmem:[#allocation2 + $0xf4] ss:$8 sps:$4 sm:$0xff]  }
  0x1f   :  { %v428_v35 = vld [vmem:[#allocation2 + $0xf0] ss:$8 sps:$4 sm:$0xff]   ;;  %v481_v36 = vmov 839922192   ;;  %v292_v40 = vshrl.u32 %v291_v38, 7  ;;  %vm317_vm2 = vcmask 1043458  }
  0x20   :  { %v289_v37 = vunpack.c.l.s4 %v481_v36  ;;  %v277_v45 = vld [vmem:[%s544_s2] sm:$0x77]  ;;  %v482_v48 = vmov 1983009808   ;;  %vm315_vm1 = vsmask.f32 1280 }
  0x21   :  { %243 = vmatpush1.bf16.msra.mxu0 %v392_v8  ;;  %v307_v49 = vunpack.c.l.s4 %v482_v48  ;;  %vm318_vm3 = vsmask.f32 3328  ;;  %vm316_vm4 = vmand %vm314_vm0, %vm315_vm1  ;;  %s483_s2 = smov [#allocation5]   ;;  %v321_v59 = vld [vmem:[#allocation5] sm:$0xf] }
  0x22   :  { %244 = vmatprep.subr.bf16.mxu0 %v393_v9  ;;  %v290_v39 = vunpack.c.0.s8 %v289_v37  ;;  %vm319_vm5 = vmand %vm317_vm2, %vm318_vm3  ;;  %s330_s6 = sshll.u32 %s483_s2, 4  ;;  %s331_s6 = int_to_ptr.vmem [resolvable:$true] %s330_s6 }
  0x23   :  { %v308_v53 = vunpack.c.0.s8 %v307_v49  ;;  %vm320_vm6 = vmor %vm319_vm5, %vm316_vm4  ;;  %s451_s7 = scalar_lea.vmem %s331_s6, 64  ;;  %p456_p9 = scmp.lt.s32.totalorder %s331_s6, %s331_s6 }
  0x24   :  { %v293_v41 = vsub.s32 %v290_v39, %v292_v40  ;;  %p452_p8 = scmp.ne.s32.totalorder %s331_s6, %s451_s7  ;;  %p457_p10 = scmp.lt.s32.totalorder %s451_s7, %s451_s7 }
  0x25   :  { %245 = vmatpush1.bf16.msra.mxu0 %v395_v10  ;;  %v311_v56 = vsub.s32 %v308_v53, %v292_v40 }
  0x26   :  { %246 = vmatprep.subr.bf16.mxu0 %v396_v11  ;;  %p458_p11 = por %p457_p10, %p456_p9 }
  0x28   :  { %p459_p12 = pnand %p458_p11, %p452_p8 }
  0x29   :  { %247 = vmatpush1.bf16.msra.mxu0 %v398_v12 }
  0x2a   :  { %248 = vmatprep.subr.bf16.mxu0 %v399_v13 }
  0x2d   :  { %249 = vmatpush1.bf16.msra.mxu0 %v401_v17 }
  0x2e   :  { %250 = vmatprep.subr.bf16.mxu0 %v402_v18 }
  0x31   :  { %251 = vmatpush1.bf16.msra.mxu0 %v404_v19 }
  0x32   :  { %252 = vmatprep.subr.bf16.mxu0 %v405_v20 }
  0x35   :  { %253 = vmatpush1.bf16.msra.mxu0 %v407_v21 }
  0x36   :  { %254 = vmatprep.subr.bf16.mxu0 %v408_v22 }
  0x39   :  { %255 = vmatpush1.bf16.msra.mxu0 %v410_v23 }
  0x3a   :  { %256 = vmatprep.subr.bf16.mxu0 %v411_v24 }
  0x3d   :  { %257 = vmatpush1.bf16.msra.mxu0 %v413_v25 }
  0x3e   :  { %258 = vmatprep.subr.bf16.mxu0 %v414_v26 }
  0x41   :  { %259 = vmatpush1.bf16.msra.mxu0 %v416_v27 }
  0x42   :  { %260 = vmatprep.subr.bf16.mxu0 %v417_v28 }
  0x45   :  { %261 = vmatpush1.bf16.msra.mxu0 %v419_v29 }
  0x46   :  { %262 = vmatprep.subr.bf16.mxu0 %v420_v30 }
  0x49   :  { %263 = vmatpush1.bf16.msra.mxu0 %v422_v31 }
  0x4a   :  { %264 = vmatprep.subr.bf16.mxu0 %v423_v32 }
  0x4d   :  { %265 = vmatpush1.bf16.msra.mxu0 %v425_v33 }
  0x4e   :  { %266 = vmatprep.subr.bf16.mxu0 %v426_v34 }
  0x51   :  { %267 = vmatpush1.bf16.msra.mxu0 %v428_v35 }
  0x54   :  { %269 = vmatmul.mubr.bf16.vlgmr.msra.gmra.mrb[0].mxu0 %v339_v14 }
  0x99   :  { %v287_v42 = vpop.permute.xlu0 %286 }
  0x9a   :  { %v294_v50 = vrot.slane %v287_v42, %v293_v41 }
 0x127   :  { %v270_v43 = vpop.f32.mrb[0].mxu0 }
 0x128   :  { %v272_v44 = vpop.f32.mrb[1].mxu0 }
 0x129   :  { %v280_v46 = vcombine.low %v270_v43, %v272_v44  ;;  %v274_v47 = vpop.f32.mrb[2].mxu0 }
 0x12a   :  { %v275_v51 = vpop.f32.mrb[3].mxu0 }
 0x12b   :  { %v282_v52 = vadd.f32 %v280_v46, %v277_v45 }
 0x12d   :  { %v296_v54 = vadd.f32 %v294_v50, %v282_v52 }
 0x12f   :  { %v297_v55 = vmax.f32 %v296_v54, 0.0 }
 0x131   :  { %v299_v57 = vcombine.high %v297_v55, %v297_v55 }
 0x133   :  { %v372_v58 = vpack.c.bf16 %v299_v57, %v297_v55 }
 0x135   :  { %v312_v60 = vrot.slane %v372_v58, %v311_v56 }
 0x137   :  { %v322_v61 = vsel %vm320_vm6, %v312_v60, %v321_v59 }
 0x138   :  { %323 = vst [vmem:[#allocation5] sm:$0xf] %v322_v61 }
 0x139   :  { %462 = shalt.err (!%p459_p12)
}
 0x13a   :  { %s463_s10 = scalar_lea.hbm %s546_s4, 64 }
 0x13b   :  { %p464_p13 = scmp.ne.s32.totalorder %s546_s4, %s463_s10  ;;  %p467_p0 = scmp.lt.u32.totalorder %s463_s10, %s546_s4 }
 0x13d   :  { %p469_p1 = pnand %p467_p0, %p464_p13 }
 0x13f   :  { %472 = shalt.err (!%p469_p1)
}
 0x140   :  { %333 = dma.vmem_to_hbm [thread:$0]  %s331_s6, 64, %s546_s4, [#allocation4]  }
 0x141   :  { %475 = dma.done.wait [#allocation4], 64  }
 0x142   :  { %476 = vsyncadd [#allocation4], 4294967232 }
 0x143   :  { %337 = vsyncpa [#allocation3], 1 }
 0x144   :  { %338 = vsyncpa [#allocation4], 1 }

</bundles_post_ra>
